<compile_context>
chip_gen: v5e
topology: v5e:2x2
jax: 0.10.0
libtpu: 0.0.40
codegen_flags: <defaults>
</compile_context>

<pallas_src>
import warnings
from functools import partial

import jax
import jax.numpy as jnp
from jax.experimental import pallas as pl
from jax.experimental.pallas import tpu as pltpu


def _linear_kernel(x_ref, w_ref, b_ref, o_ref, acc_ref):
    """One (M,N) output tile, accumulated over the K grid axis.

    x_ref: (tm, tk)  bf16 input tile
    w_ref: (tk, tn)  bf16 pre-transposed weight tile
    b_ref: (1, tn)   f32 bias row tile
    o_ref: (tm, tn)  output tile (same block across the K axis)
    acc_ref: (tm, tn) f32 VMEM accumulator scratch
    """
    k = pl.program_id(2)

    @pl.when(k == 0)
    def _():
        # Fold the bias into the accumulator init (saves an epilogue add).
        acc_ref[...] = jnp.broadcast_to(
            b_ref[...].astype(jnp.float32), acc_ref.shape
        )

    acc_ref[...] += jnp.dot(
        x_ref[...], w_ref[...], preferred_element_type=jnp.float32
    )

    @pl.when(k == pl.num_programs(2) - 1)
    def _():
        o_ref[...] = acc_ref[...].astype(o_ref.dtype)


def _round_up(x, m):
    return ((x + m - 1) // m) * m


def _pick_tile(dim, cap, align):
    """Largest `align`-aligned divisor of `dim` that is <= cap.

    `dim` must be a multiple of `align` (guaranteed by the 128-padding of K/N),
    so this always returns something in [align, cap] -- no full-extent fallback
    that could exceed the scoped VMEM limit.
    """
    if dim <= cap:
        return dim
    t = (cap // align) * align
    while t >= align:
        if dim % t == 0:
            return t
        t -= align
    return align


@partial(jax.jit, static_argnames=("n_valid",))
def pallas_linear(x, w_t, b_row, n_valid):
    """Dense forward of torch.nn.Linear: y = x @ w_t + b_row.

    x:       (M, K)   activations (any float dtype; cast to bf16 for the MXU)
    w_t:     (Kp, Np) bf16 weight, pre-transposed and 128-padded at init
    b_row:   (1, Np)  f32 bias row, 128-padded at init
    n_valid: true out_features (output is sliced back to this width)
    """
    out_dtype = x.dtype
    M, K = x.shape
    Kp, Np = w_t.shape

    # bf16 operands, f32 accumulate.  Pad K of x to match the padded weight
    # (zero rows contribute nothing to the accumulation).
    x = x.astype(w_t.dtype)
    if Kp != K:
        x = jnp.pad(x, ((0, 0), (0, Kp - K)))

    # ---- tile selection -----------------------------------------------------
    # M: multiple of 16 (bf16 sublane packing); larger tile for large M to cut
    # repeated weight streaming.  The M grid uses cdiv + edge masking, so no
    # full-array pad of x is needed.
    tm_cap = 512 if M >= 512 else 256
    tm = min(tm_cap, _round_up(M, 16))
    grid_m = pl.cdiv(M, tm)

    # K / N: Kp, Np are multiples of 128, so a 128-aligned divisor always exists.
    tk = _pick_tile(Kp, 512, 128)
    tn = _pick_tile(Np, 1024, 128)

    # Megacore: make sure there are >= 2 independent (i, j) tiles when possible
    # so v7x's second TensorCore is not idle on small-batch shapes.
    if grid_m == 1 and Np // tn == 1 and Np >= 256:
        half_cap = max(128, ((Np // 2) // 128) * 128)
        tn = _pick_tile(Np, half_cap, 128)

    grid = (grid_m, Np // tn, Kp // tk)

    # Double-buffered bf16 x/w tiles + f32 out tile + f32 acc: ~10 MiB at the
    # largest caps -- well inside the 48 MiB scoped limit below (v7x physical
    # VMEM is 64 MiB; v5e/v6e have 128 MiB).
    out = pl.pallas_call(
        _linear_kernel,
        out_shape=jax.ShapeDtypeStruct((M, Np), out_dtype),
        grid_spec=pltpu.PrefetchScalarGridSpec(
            num_scalar_prefetch=0,
            grid=grid,
            in_specs=[
                pl.BlockSpec((tm, tk), lambda i, j, k: (i, k)),   # x (bf16)
                pl.BlockSpec((tk, tn), lambda i, j, k: (k, j)),   # W^T (bf16)
                pl.BlockSpec((1, tn), lambda i, j, k: (0, j)),    # bias row
            ],
            out_specs=pl.BlockSpec((tm, tn), lambda i, j, k: (i, j)),
            scratch_shapes=[pltpu.VMEM((tm, tn), jnp.float32)],
        ),
        compiler_params=pltpu.CompilerParams(
            # M/N tiles are independent (megacore-shardable); K is the
            # reduction axis.
            dimension_semantics=("parallel", "parallel", "arbitrary"),
            vmem_limit_bytes=48 * 1024 * 1024,
        ),
        # TODO(synk): if profiling the small-M mem-bound regime shows exposed
        # weight DMA, add pipeline_mode=pl.Buffered(3) on the weight BlockSpec.
    )(x, w_t, b_row)

    if n_valid != Np:
        out = out[:, :n_valid]
    return out


class OperatorBaseJAX:
    """Minimal JAX mirror of SparTA's OperatorBase (uncompiled path only).

    forward() warns (once) that the sparse module is not compiled and runs the
    dense raw module (nn.Linear equivalent) via the Pallas kernel above.
    """

    def __init__(self, weight, bias):
        # "Raw module" parameters of the dense torch.nn.Linear equivalent.
        # Hoist the transpose, bf16 cast, and 128-padding of K/N out of the
        # per-call forward path (done once, kept resident in HBM).
        weight = jnp.asarray(weight)          # (N, K)
        bias = jnp.asarray(bias)              # (N,)
        n_out, k_in = weight.shape
        kp = _round_up(k_in, 128)
        np_ = _round_up(n_out, 128)

        w_t = weight.T.astype(jnp.bfloat16)   # (K, N)
        if (kp, np_) != (k_in, n_out):
            w_t = jnp.pad(w_t, ((0, kp - k_in), (0, np_ - n_out)))
        self._w_t = w_t                        # (Kp, Np) bf16

        b_row = bias.astype(jnp.float32).reshape(1, -1)
        if np_ != n_out:
            b_row = jnp.pad(b_row, ((0, 0), (0, np_ - n_out)))
        self._b_row = b_row                    # (1, Np) f32

        self._out_features = n_out
        self.ready = False
        self._warned = False
        # TODO(synk): sparse context (mask ports, TeSA indexes, tuning search
        # space, kernel placeholders, compile/build) is build-time metadata
        # with no runtime compute; not translatable to a Pallas kernel.

    def _dense_forward(self, x):
        return pallas_linear(x, self._w_t, self._b_row, self._out_features)

    def forward(self, x):
        if not self._warned:
            warnings.warn(
                "the sparse module is not compiled, using the dense module to forward"
            )
            self._warned = True
        return self._dense_forward(x)

    __call__ = forward


if __name__ == "__main__":
    # Small shapes consistent with a Linear raw module:
    # batch=2, seq=8 -> M = 16 rows; in_features=32, out_features=64.
    batch, seq, in_features, out_features = 2, 8, 32, 64
    M = batch * seq

    key = jax.random.PRNGKey(0)
    kx, kw, kb = jax.random.split(key, 3)

    x = jax.random.normal(kx, (M, in_features), dtype=jnp.float32)
    # Deterministic Kaiming-uniform-ish init, same bounds as torch.nn.Linear.
    bound = 1.0 / (in_features ** 0.5)
    weight = jax.random.uniform(
        kw, (out_features, in_features), dtype=jnp.float32, minval=-bound, maxval=bound
    )
    bias = jax.random.uniform(
        kb, (out_features,), dtype=jnp.float32, minval=-bound, maxval=bound
    )

    op = OperatorBaseJAX(weight, bias)
    y = op(x)
    y = jax.block_until_ready(y)

    # Correctness check against plain-JAX dense forward (x @ W^T + b).
    # Tolerance loosened for the bf16 operand path (f32 accumulation).
    y_ref = x @ weight.T + bias
    assert y.shape == (M, out_features)
    assert jnp.allclose(y, y_ref, atol=5e-2, rtol=5e-2)

    print("KERNEL_OK")
</pallas_src>

<mosaic_0001>
module attributes {stable_mosaic.version = 11 : i64} {
  func.func @_linear_kernel(%arg0: i32, %arg1: i32, %arg2: i32, %arg3: memref<16x128xbf16, #tpu.memory_space<vmem>>, %arg4: memref<128x128xbf16, #tpu.memory_space<vmem>>, %arg5: memref<1x128xf32, #tpu.memory_space<vmem>>, %arg6: memref<16x128xf32, #tpu.memory_space<vmem>>, %arg7: memref<16x128xf32, #tpu.memory_space<vmem>>) attributes {dimension_semantics = [#tpu.dimension_semantics<parallel>, #tpu.dimension_semantics<parallel>, #tpu.dimension_semantics<arbitrary>], iteration_bounds = array<i64: 1, 1, 1>, scalar_prefetch = 0 : i64, scratch_operands = 1 : i64, tpu.core_type = #tpu.core_type<tc>, window_params = [{transform_indices = @transform_0, window_bounds = array<i64: 16, 128>}, {transform_indices = @transform_1, window_bounds = array<i64: 128, 128>}, {transform_indices = @transform_2, window_bounds = array<i64: 1, 128>}, {transform_indices = @transform_3, window_bounds = array<i64: 16, 128>}]} {
    %c0_i32 = arith.constant 0 : i32
    %0 = arith.cmpi eq, %arg2, %c0_i32 : i32
    %1 = arith.extui %0 : i1 to i32
    %c0_i32_0 = arith.constant 0 : i32
    %2 = arith.cmpi ne, %1, %c0_i32_0 : i32
    scf.if %2 {
      %c0_10 = arith.constant 0 : index
      %c0_11 = arith.constant 0 : index
      %12 = vector.load %arg5[%c0_10, %c0_11] : memref<1x128xf32, #tpu.memory_space<vmem>>, vector<1x128xf32>
      %13 = vector.shape_cast %12 : vector<1x128xf32> to vector<1x128xf32>
      %14 = vector.broadcast %13 : vector<1x128xf32> to vector<16x128xf32>
      %c0_12 = arith.constant 0 : index
      %c0_13 = arith.constant 0 : index
      %15 = vector.load %arg7[%c0_12, %c0_13] : memref<16x128xf32, #tpu.memory_space<vmem>>, vector<16x128xf32>
      tpu.vector_store %arg7[%c0_12, %c0_13], %14 {strides = array<i32>} : memref<16x128xf32, #tpu.memory_space<vmem>>, vector<16x128xf32>,
    } else {
    }
    %c0 = arith.constant 0 : index
    %c0_1 = arith.constant 0 : index
    %3 = vector.load %arg7[%c0, %c0_1] : memref<16x128xf32, #tpu.memory_space<vmem>>, vector<16x128xf32>
    %c0_2 = arith.constant 0 : index
    %c0_3 = arith.constant 0 : index
    %4 = vector.load %arg3[%c0_2, %c0_3] : memref<16x128xbf16, #tpu.memory_space<vmem>>, vector<16x128xbf16>
    %c0_4 = arith.constant 0 : index
    %c0_5 = arith.constant 0 : index
    %5 = vector.load %arg4[%c0_4, %c0_5] : memref<128x128xbf16, #tpu.memory_space<vmem>>, vector<128x128xbf16>
    %cst = arith.constant dense<0.000000e+00> : vector<16x128xf32>
    %6 = tpu.matmul %4, %5, %cst {dimension_numbers = #tpu.dot_dimension_numbers<[1], [0], [0], [1], [0, 0, 1, 1], [], []>} : vector<16x128xbf16>, vector<128x128xbf16>, vector<16x128xf32> -> vector<16x128xf32>
    %7 = arith.addf %3, %6 : vector<16x128xf32>
    %c0_6 = arith.constant 0 : index
    %c0_7 = arith.constant 0 : index
    %8 = vector.load %arg7[%c0_6, %c0_7] : memref<16x128xf32, #tpu.memory_space<vmem>>, vector<16x128xf32>
    tpu.vector_store %arg7[%c0_6, %c0_7], %7 {strides = array<i32>} : memref<16x128xf32, #tpu.memory_space<vmem>>, vector<16x128xf32>,
    %c0_i32_8 = arith.constant 0 : i32
    %9 = arith.cmpi eq, %arg2, %c0_i32_8 : i32
    %10 = arith.extui %9 : i1 to i32
    %c0_i32_9 = arith.constant 0 : i32
    %11 = arith.cmpi ne, %10, %c0_i32_9 : i32
    scf.if %11 {
      %c0_10 = arith.constant 0 : index
      %c0_11 = arith.constant 0 : index
      %12 = vector.load %arg7[%c0_10, %c0_11] : memref<16x128xf32, #tpu.memory_space<vmem>>, vector<16x128xf32>
      %c0_12 = arith.constant 0 : index
      %c0_13 = arith.constant 0 : index
      %13 = vector.load %arg6[%c0_12, %c0_13] : memref<16x128xf32, #tpu.memory_space<vmem>>, vector<16x128xf32>
      tpu.vector_store %arg6[%c0_12, %c0_13], %12 {strides = array<i32>} : memref<16x128xf32, #tpu.memory_space<vmem>>, vector<16x128xf32>,
    } else {
    }
    return
  }
  func.func @transform_0(%arg0: i32, %arg1: i32, %arg2: i32) -> (i32, i32) {
    %c0_i32 = arith.constant 0 : i32
    return %arg0, %arg2 : i32, i32
  }
  func.func @transform_1(%arg0: i32, %arg1: i32, %arg2: i32) -> (i32, i32) {
    %c0_i32 = arith.constant 0 : i32
    return %arg2, %arg1 : i32, i32
  }
  func.func @transform_2(%arg0: i32, %arg1: i32, %arg2: i32) -> (i32, i32) {
    %c0_i32 = arith.constant 0 : i32
    %c0_i32_0 = arith.constant 0 : i32
    return %c0_i32, %arg1 : i32, i32
  }
  func.func @transform_3(%arg0: i32, %arg1: i32, %arg2: i32) -> (i32, i32) {
    %c0_i32 = arith.constant 0 : i32
    return %arg0, %arg1 : i32, i32
  }
}

</mosaic_0001>

<bundles_post_ra>
// kernel: pallas_linear.1
= control target key start
LH: loop header
LB: loop body
LE: loop exit
PB: predicated region body
PF: predicated region fallthrough
CT: control target
= control target key end

     0   :  { %8 = vsyncpa [#allocation4], 0  ;;  %s301_s0 = inlined_call_operand.vmem [shape: bf16[16,128], index: 0, kind: input, shape index: {}]   ;;  %s302_s1 = inlined_call_operand.hbm [shape: bf16[128,128], index: 1, kind: input, shape index: {}]   ;;  %s303_s2 = inlined_call_operand.vmem [shape: f32[1,128], index: 2, kind: input, shape index: {}]   ;;  %s304_s3 = inlined_call_operand.hbm [shape: f32[16,128], index: 3, kind: output, shape index: {}]  }
   0x1   :  { %9 = vsyncpa [#allocation5], 0  ;;  %s16_s14 = sshll.u32 %s302_s1, 4  ;;  %s263_s15 = smov [#allocation3]   ;;  %s17_s14 = int_to_ptr.hbm [resolvable:$true] %s16_s14 }
   0x2   :  { %s18_s16 = sshll.u32 %s263_s15, 4  ;;  %s264_s17 = smov 64   ;;  %s19_s16 = int_to_ptr.vmem [resolvable:$true] %s18_s16 }
   0x3   :  { %s265_s18 = smov 4  }
   0x4   :  { %24 = dma.hbm_to_vmem [thread:$0]  %s17_s14, 1024, %s19_s16, [#allocation4], %s264_s17, %s264_s17, %s265_s18  }
   0x5   :  { %259 = dma.done.wait [#allocation4], 1024  }
   0x6   :  { %260 = vsyncadd [#allocation4], 4294966272  ;;  %v203_v0 = vld [vmem:[#allocation3 + $0x38] sm:$0xff]  ;;  %v202_v1 = vld [vmem:[#allocation3 + $0x30] sm:$0xff]  ;;  %s266_s22 = smov [#allocation6]   ;;  %s146_s26 = sshll.u32 %s304_s3, 4  ;;  %s147_s26 = int_to_ptr.hbm [resolvable:$true] %s146_s26 }
   0x7   :  { %115 = vmatpush.bf16.msra.mxu0 %v203_v0  ;;  %v201_v2 = vld [vmem:[#allocation3 + $0x28] sm:$0xff]  ;;  %v200_v3 = vld [vmem:[#allocation3 + $0x20] sm:$0xff]  ;;  %v199_v4 = vld [vmem:[#allocation3 + $0x18] sm:$0xff]  ;;  %s144_s23 = sshll.u32 %s266_s22, 4  ;;  %s268_s27 = smov 8   ;;  %s145_s23 = int_to_ptr.vmem [resolvable:$true] %s144_s23 }
   0x8   :  { %v198_v5 = vld [vmem:[#allocation3 + $0x10] sm:$0xff]  ;;  %v197_v6 = vld [vmem:[#allocation3 + $0x8] sm:$0xff]  ;;  %v196_v7 = vld [vmem:[#allocation3] sm:$0xff] }
   0x9   :  { %v195_v8 = vld [vmem:[%s301_s0] sm:$0xff]  ;;  %s267_s0 = smov 128  }
   0xa   :  { %v210_v9 = vld [vmem:[%s303_s2] ss:$0 sm:$0xff] }
   0xb   :  { %116 = vmatpush.bf16.msra.mxu0 %v202_v1 }
   0xf   :  { %117 = vmatpush.bf16.msra.mxu0 %v201_v2 }
  0x13   :  { %118 = vmatpush.bf16.msra.mxu0 %v200_v3 }
  0x17   :  { %119 = vmatpush.bf16.msra.mxu0 %v199_v4 }
  0x1b   :  { %120 = vmatpush.bf16.msra.mxu0 %v198_v5 }
  0x1f   :  { %121 = vmatpush.bf16.msra.mxu0 %v197_v6 }
  0x23   :  { %122 = vmatpush.bf16.msra.mxu0 %v196_v7 }
  0x26   :  { %123 = vmatmul.bf16.vlgmr.msra.gmra.mxu0 %v195_v8 }
  0xa3   :  { %v124_v10 = vpop.f32.mrf.mxu0 }
  0xa4   :  { %v129_v11 = vadd.f32 %v210_v9, %v124_v10 }
  0xa6   :  { %138 = vst [vmem:[#allocation6] sm:$0xff] %v129_v11 }
  0xab   :  { %v126_v12 = vpop.f32.mrf.mxu0 }
  0xac   :  { %v130_v13 = vadd.f32 %v210_v9, %v126_v12 }
  0xae   :  { %139 = vst [vmem:[#allocation6 + $0x8] sm:$0xff] %v130_v13 }
  0xaf   :  { %152 = dma.vmem_to_hbm [thread:$0]  %s145_s23, 256, %s147_s26, [#allocation5], %s267_s0, %s267_s0, %s268_s27  }
  0xb0   :  { %261 = dma.done.wait [#allocation5], 256  }
  0xb1   :  { %262 = vsyncadd [#allocation5], 4294967040 }
  0xb2   :  { %157 = vsyncpa [#allocation4], 1 }
  0xb3   :  { %158 = vsyncpa [#allocation5], 1 }

</bundles_post_ra>
